<compile_context>
chip_gen: v5e
topology: v5e:2x2
jax: 0.10.0
libtpu: 0.0.40
codegen_flags: <defaults>
</compile_context>

<pallas_src>
import functools

import jax
import jax.numpy as jnp
from jax.experimental import pallas as pl
from jax.experimental.pallas import tpu as pltpu

# ---------------- model config (small synthetic shapes) ----------------
PATCH = 4
HIDDEN = 32
NUM_HEADS = 2
HEAD_DIM = HIDDEN // NUM_HEADS
MLP_DIM = 64
FEAT_DIM = 32
LN_EPS = 1e-6

# order in which parameters are passed to the fused kernel
_PARAM_ORDER = (
    "w_patch", "b_patch", "pos_embed",
    "ln1_g", "ln1_b",
    "w_qkv", "b_qkv",
    "w_o", "b_o",
    "ln2_g", "ln2_b",
    "w_mlp1", "b_mlp1", "w_mlp2", "b_mlp2",
    "lnf_g", "lnf_b",
    "w_proj",
)


# ---------------- fused forward kernel (one grid step = one image) ----------------
def _fused_vit_kernel(patches_ref,
                      w_patch_ref, b_patch_ref, pos_ref,
                      ln1g_ref, ln1b_ref,
                      wqkv_ref, bqkv_ref,
                      wo_ref, bo_ref,
                      ln2g_ref, ln2b_ref,
                      w1_ref, b1_ref, w2_ref, b2_ref,
                      lnfg_ref, lnfb_ref,
                      wproj_ref,
                      o_ref):
    x = patches_ref[0].astype(jnp.float32)                          # (Np, C*P*P)

    def layer_norm(t, g, b):
        mean = jnp.mean(t, axis=-1, keepdims=True)
        tc = t - mean
        var = jnp.mean(tc * tc, axis=-1, keepdims=True)
        return tc * jax.lax.rsqrt(var + LN_EPS) * g + b

    # ---- patch embedding (Conv2d(k=s=P) as matmul) + positional embedding ----
    h = jnp.dot(x, w_patch_ref[...], preferred_element_type=jnp.float32)
    h = h + b_patch_ref[...] + pos_ref[...]                          # (Np, D)

    # ---- attention block (pre-LN), QKV fused into one matmul ----
    hn = layer_norm(h, ln1g_ref[...], ln1b_ref[...])
    qkv = jnp.dot(hn, wqkv_ref[...], preferred_element_type=jnp.float32)
    qkv = qkv + bqkv_ref[...]                                        # (Np, 3D)

    scale = 1.0 / (HEAD_DIM ** 0.5)
    head_outs = []
    for hd in range(NUM_HEADS):                                      # static unroll
        q = qkv[:, hd * HEAD_DIM:(hd + 1) * HEAD_DIM]
        k = qkv[:, HIDDEN + hd * HEAD_DIM:HIDDEN + (hd + 1) * HEAD_DIM]
        v = qkv[:, 2 * HIDDEN + hd * HEAD_DIM:2 * HIDDEN + (hd + 1) * HEAD_DIM]
        s = jnp.dot(q, k.T, preferred_element_type=jnp.float32) * scale
        m = jnp.max(s, axis=-1, keepdims=True)
        p = jnp.exp(s - m)
        denom = jnp.sum(p, axis=-1, keepdims=True)
        p = p * pl.reciprocal(denom, approx=True)                    # EUP, ~free
        head_outs.append(jnp.dot(p, v, preferred_element_type=jnp.float32))
    attn = jnp.concatenate(head_outs, axis=-1)                       # (Np, D)

    h = h + jnp.dot(attn, wo_ref[...],
                    preferred_element_type=jnp.float32) + bo_ref[...]

    # ---- MLP block (pre-LN) ----
    hn = layer_norm(h, ln2g_ref[...], ln2b_ref[...])
    m1 = jnp.dot(hn, w1_ref[...], preferred_element_type=jnp.float32) + b1_ref[...]
    # TODO(synk): PyTorch nn.GELU defaults to exact erf (HF CLIP uses quick_gelu);
    # tanh approximation is used here since it maps to the EUP on all TPU gens.
    m1 = jax.nn.gelu(m1, approximate=True)
    h = h + jnp.dot(m1, w2_ref[...],
                    preferred_element_type=jnp.float32) + b2_ref[...]

    # ---- final LayerNorm, mean-pool over tokens, feature projection ----
    h = layer_norm(h, lnfg_ref[...], lnfb_ref[...])
    pooled = jnp.mean(h, axis=0, keepdims=True)                      # (1, D)
    feats = jnp.dot(pooled, wproj_ref[...],
                    preferred_element_type=jnp.float32)              # (1, F)
    o_ref[0] = feats.astype(o_ref.dtype)


# ---------------- forward: get_image_features ----------------
@jax.jit
def get_image_features(pixel_values, params):
    B, C, H, W = pixel_values.shape
    P = PATCH
    Hp, Wp = H // P, W // P
    Np = Hp * Wp
    CPP = C * P * P

    # im2col: NCHW -> [B, Np, C*P*P]  (matches nn.Conv2d(C, D, kernel=stride=P))
    x = pixel_values.reshape(B, C, Hp, P, Wp, P)
    x = x.transpose(0, 2, 4, 1, 3, 5)
    patches = x.reshape(B, Np, CPP)

    param_list = [params[name] for name in _PARAM_ORDER]

    in_specs = [pl.BlockSpec((1, Np, CPP), lambda b: (b, 0, 0))]
    # all parameters are 2-D, passed whole, identical for every grid step
    in_specs += [pl.BlockSpec(p.shape, lambda b: (0, 0)) for p in param_list]

    feats = pl.pallas_call(
        _fused_vit_kernel,
        out_shape=jax.ShapeDtypeStruct((B, 1, FEAT_DIM), pixel_values.dtype),
        grid=(B,),
        in_specs=in_specs,
        out_specs=pl.BlockSpec((1, 1, FEAT_DIM), lambda b: (b, 0, 0)),
        compiler_params=pltpu.CompilerParams(
            dimension_semantics=("parallel",)),   # shards over v7x's 2 TCs
    )(patches, *param_list)

    return feats.reshape(B, FEAT_DIM)


# ---------------- parameter init (deterministic) ----------------
def init_params(channels, image_size, dtype=jnp.float32):
    num_patches = (image_size // PATCH) ** 2
    key = jax.random.PRNGKey(42)
    ks = iter(jax.random.split(key, 16))

    def w(k, shape, scale=0.02):
        return (scale * jax.random.normal(k, shape)).astype(dtype)

    # QKV weights fused into a single [D, 3D] matrix (single MXU pass).
    wq = w(next(ks), (HIDDEN, HIDDEN))
    wk = w(next(ks), (HIDDEN, HIDDEN))
    wv = w(next(ks), (HIDDEN, HIDDEN))

    params = {
        # PyTorch Conv2d weight layout [D, C, P, P] flattened -> [C*P*P, D]
        "w_patch": w(next(ks), (HIDDEN, channels, PATCH, PATCH))
        .reshape(HIDDEN, channels * PATCH * PATCH).T,
        "b_patch": jnp.zeros((1, HIDDEN), dtype),
        "pos_embed": w(next(ks), (num_patches, HIDDEN)),
        "ln1_g": jnp.ones((1, HIDDEN), dtype), "ln1_b": jnp.zeros((1, HIDDEN), dtype),
        "w_qkv": jnp.concatenate([wq, wk, wv], axis=1),
        "b_qkv": jnp.zeros((1, 3 * HIDDEN), dtype),
        "w_o": w(next(ks), (HIDDEN, HIDDEN)),
        "b_o": jnp.zeros((1, HIDDEN), dtype),
        "ln2_g": jnp.ones((1, HIDDEN), dtype), "ln2_b": jnp.zeros((1, HIDDEN), dtype),
        "w_mlp1": w(next(ks), (HIDDEN, MLP_DIM)),
        "b_mlp1": jnp.zeros((1, MLP_DIM), dtype),
        "w_mlp2": w(next(ks), (MLP_DIM, HIDDEN)),
        "b_mlp2": jnp.zeros((1, HIDDEN), dtype),
        "lnf_g": jnp.ones((1, HIDDEN), dtype), "lnf_b": jnp.zeros((1, HIDDEN), dtype),
        "w_proj": w(next(ks), (HIDDEN, FEAT_DIM)),
    }
    return params


class FeatureWrapper:
    """JAX/Pallas analogue of the PyTorch FeatureWrapper."""

    def __init__(self, model_name="synthetic-clip-vision", dtype=jnp.float32,
                 channels=3, image_size=16):
        self.model_name = model_name
        self.dtype = dtype
        self.params = init_params(channels, image_size, dtype)

    def __call__(self, pixel_values):
        return get_image_features(pixel_values.astype(self.dtype), self.params)


if __name__ == "__main__":
    B, C, H, W = 2, 3, 16, 16
    pixel_values = jax.random.normal(jax.random.PRNGKey(0), (B, C, H, W),
                                     dtype=jnp.float32)
    wrapper = FeatureWrapper(channels=C, image_size=H)
    feats = wrapper(pixel_values)
    feats = jax.block_until_ready(feats)
    assert feats.shape == (B, FEAT_DIM), feats.shape
    assert bool(jnp.all(jnp.isfinite(feats)))
    print("KERNEL_OK")
</pallas_src>

<mosaic_0001>
module attributes {stable_mosaic.version = 11 : i64} {
  func.func @_fused_vit_kernel(%arg0: i32, %arg1: memref<1x16x48xf32, #tpu.memory_space<vmem>>, %arg2: memref<48x32xf32, #tpu.memory_space<vmem>>, %arg3: memref<1x32xf32, #tpu.memory_space<vmem>>, %arg4: memref<16x32xf32, #tpu.memory_space<vmem>>, %arg5: memref<1x32xf32, #tpu.memory_space<vmem>>, %arg6: memref<1x32xf32, #tpu.memory_space<vmem>>, %arg7: memref<32x96xf32, #tpu.memory_space<vmem>>, %arg8: memref<1x96xf32, #tpu.memory_space<vmem>>, %arg9: memref<32x32xf32, #tpu.memory_space<vmem>>, %arg10: memref<1x32xf32, #tpu.memory_space<vmem>>, %arg11: memref<1x32xf32, #tpu.memory_space<vmem>>, %arg12: memref<1x32xf32, #tpu.memory_space<vmem>>, %arg13: memref<32x64xf32, #tpu.memory_space<vmem>>, %arg14: memref<1x64xf32, #tpu.memory_space<vmem>>, %arg15: memref<64x32xf32, #tpu.memory_space<vmem>>, %arg16: memref<1x32xf32, #tpu.memory_space<vmem>>, %arg17: memref<1x32xf32, #tpu.memory_space<vmem>>, %arg18: memref<1x32xf32, #tpu.memory_space<vmem>>, %arg19: memref<32x32xf32, #tpu.memory_space<vmem>>, %arg20: memref<1x1x32xf32, #tpu.memory_space<vmem>>) attributes {dimension_semantics = [#tpu.dimension_semantics<parallel>], iteration_bounds = array<i64: 2>, scalar_prefetch = 0 : i64, scratch_operands = 0 : i64, tpu.core_type = #tpu.core_type<tc>, window_params = [{transform_indices = @transform_0, window_bounds = array<i64: 1, 16, 48>}, {pipeline_mode = #tpu.pipeline_mode<synchronous>, transform_indices = @transform_1, window_bounds = array<i64: 48, 32>}, {pipeline_mode = #tpu.pipeline_mode<synchronous>, transform_indices = @transform_2, window_bounds = array<i64: 1, 32>}, {pipeline_mode = #tpu.pipeline_mode<synchronous>, transform_indices = @transform_3, window_bounds = array<i64: 16, 32>}, {pipeline_mode = #tpu.pipeline_mode<synchronous>, transform_indices = @transform_4, window_bounds = array<i64: 1, 32>}, {pipeline_mode = #tpu.pipeline_mode<synchronous>, transform_indices = @transform_5, window_bounds = array<i64: 1, 32>}, {pipeline_mode = #tpu.pipeline_mode<synchronous>, transform_indices = @transform_6, window_bounds = array<i64: 32, 96>}, {pipeline_mode = #tpu.pipeline_mode<synchronous>, transform_indices = @transform_7, window_bounds = array<i64: 1, 96>}, {pipeline_mode = #tpu.pipeline_mode<synchronous>, transform_indices = @transform_8, window_bounds = array<i64: 32, 32>}, {pipeline_mode = #tpu.pipeline_mode<synchronous>, transform_indices = @transform_9, window_bounds = array<i64: 1, 32>}, {pipeline_mode = #tpu.pipeline_mode<synchronous>, transform_indices = @transform_10, window_bounds = array<i64: 1, 32>}, {pipeline_mode = #tpu.pipeline_mode<synchronous>, transform_indices = @transform_11, window_bounds = array<i64: 1, 32>}, {pipeline_mode = #tpu.pipeline_mode<synchronous>, transform_indices = @transform_12, window_bounds = array<i64: 32, 64>}, {pipeline_mode = #tpu.pipeline_mode<synchronous>, transform_indices = @transform_13, window_bounds = array<i64: 1, 64>}, {pipeline_mode = #tpu.pipeline_mode<synchronous>, transform_indices = @transform_14, window_bounds = array<i64: 64, 32>}, {pipeline_mode = #tpu.pipeline_mode<synchronous>, transform_indices = @transform_15, window_bounds = array<i64: 1, 32>}, {pipeline_mode = #tpu.pipeline_mode<synchronous>, transform_indices = @transform_16, window_bounds = array<i64: 1, 32>}, {pipeline_mode = #tpu.pipeline_mode<synchronous>, transform_indices = @transform_17, window_bounds = array<i64: 1, 32>}, {pipeline_mode = #tpu.pipeline_mode<synchronous>, transform_indices = @transform_18, window_bounds = array<i64: 32, 32>}, {transform_indices = @transform_19, window_bounds = array<i64: 1, 1, 32>}]} {
    %c0 = arith.constant 0 : index
    %c0_0 = arith.constant 0 : index
    %c0_1 = arith.constant 0 : index
    %0 = vector.load %arg1[%c0, %c0_0, %c0_1] : memref<1x16x48xf32, #tpu.memory_space<vmem>>, vector<1x16x48xf32>
    %1 = vector.shape_cast %0 : vector<1x16x48xf32> to vector<16x48xf32>
    %c0_2 = arith.constant 0 : index
    %c0_3 = arith.constant 0 : index
    %2 = vector.load %arg2[%c0_2, %c0_3] : memref<48x32xf32, #tpu.memory_space<vmem>>, vector<48x32xf32>
    %cst = arith.constant dense<0.000000e+00> : vector<16x32xf32>
    %3 = tpu.matmul %1, %2, %cst {dimension_numbers = #tpu.dot_dimension_numbers<[1], [0], [0], [1], [0, 0, 1, 1], [], []>} : vector<16x48xf32>, vector<48x32xf32>, vector<16x32xf32> -> vector<16x32xf32>
    %c0_4 = arith.constant 0 : index
    %c0_5 = arith.constant 0 : index
    %4 = vector.load %arg3[%c0_4, %c0_5] : memref<1x32xf32, #tpu.memory_space<vmem>>, vector<1x32xf32>
    %5 = vector.broadcast %4 : vector<1x32xf32> to vector<16x32xf32>
    %6 = arith.addf %3, %5 : vector<16x32xf32>
    %c0_6 = arith.constant 0 : index
    %c0_7 = arith.constant 0 : index
    %7 = vector.load %arg4[%c0_6, %c0_7] : memref<16x32xf32, #tpu.memory_space<vmem>>, vector<16x32xf32>
    %8 = arith.addf %6, %7 : vector<16x32xf32>
    %c0_8 = arith.constant 0 : index
    %c0_9 = arith.constant 0 : index
    %9 = vector.load %arg5[%c0_8, %c0_9] : memref<1x32xf32, #tpu.memory_space<vmem>>, vector<1x32xf32>
    %c0_10 = arith.constant 0 : index
    %c0_11 = arith.constant 0 : index
    %10 = vector.load %arg6[%c0_10, %c0_11] : memref<1x32xf32, #tpu.memory_space<vmem>>, vector<1x32xf32>
    %cst_12 = arith.constant dense<0.000000e+00> : vector<16xf32>
    %11 = vector.multi_reduction <add>, %8, %cst_12 [1] : vector<16x32xf32> to vector<16xf32>
    %12 = vector.shape_cast %11 : vector<16xf32> to vector<16x1xf32>
    %cst_13 = arith.constant 3.200000e+01 : f32
    %13 = vector.broadcast %cst_13 : f32 to vector<16x1xf32>
    %14 = arith.divf %12, %13 : vector<16x1xf32>
    %15 = vector.broadcast %14 : vector<16x1xf32> to vector<16x32xf32>
    %16 = arith.subf %8, %15 : vector<16x32xf32>
    %17 = arith.mulf %16, %16 : vector<16x32xf32>
    %cst_14 = arith.constant dense<0.000000e+00> : vector<16xf32>
    %18 = vector.multi_reduction <add>, %17, %cst_14 [1] : vector<16x32xf32> to vector<16xf32>
    %19 = vector.shape_cast %18 : vector<16xf32> to vector<16x1xf32>
    %cst_15 = arith.constant 3.200000e+01 : f32
    %20 = vector.broadcast %cst_15 : f32 to vector<16x1xf32>
    %21 = arith.divf %19, %20 : vector<16x1xf32>
    %cst_16 = arith.constant 9.99999997E-7 : f32
    %22 = vector.broadcast %cst_16 : f32 to vector<16x1xf32>
    %23 = arith.addf %21, %22 : vector<16x1xf32>
    %24 = math.rsqrt %23 : vector<16x1xf32>
    %25 = vector.broadcast %24 : vector<16x1xf32> to vector<16x32xf32>
    %26 = arith.mulf %16, %25 : vector<16x32xf32>
    %27 = vector.broadcast %9 : vector<1x32xf32> to vector<16x32xf32>
    %28 = arith.mulf %26, %27 : vector<16x32xf32>
    %29 = vector.broadcast %10 : vector<1x32xf32> to vector<16x32xf32>
    %30 = arith.addf %28, %29 : vector<16x32xf32>
    %c0_17 = arith.constant 0 : index
    %c0_18 = arith.constant 0 : index
    %31 = vector.load %arg7[%c0_17, %c0_18] : memref<32x96xf32, #tpu.memory_space<vmem>>, vector<32x96xf32>
    %cst_19 = arith.constant dense<0.000000e+00> : vector<16x96xf32>
    %32 = tpu.matmul %30, %31, %cst_19 {dimension_numbers = #tpu.dot_dimension_numbers<[1], [0], [0], [1], [0, 0, 1, 1], [], []>} : vector<16x32xf32>, vector<32x96xf32>, vector<16x96xf32> -> vector<16x96xf32>
    %c0_20 = arith.constant 0 : index
    %c0_21 = arith.constant 0 : index
    %33 = vector.load %arg8[%c0_20, %c0_21] : memref<1x96xf32, #tpu.memory_space<vmem>>, vector<1x96xf32>
    %34 = vector.broadcast %33 : vector<1x96xf32> to vector<16x96xf32>
    %35 = arith.addf %32, %34 : vector<16x96xf32>
    %36 = vector.extract_strided_slice %35 {offsets = [0, 0], sizes = [16, 16], strides = [1, 1]} : vector<16x96xf32> to vector<16x16xf32>
    %37 = vector.extract_strided_slice %35 {offsets = [0, 32], sizes = [16, 16], strides = [1, 1]} : vector<16x96xf32> to vector<16x16xf32>
    %38 = vector.extract_strided_slice %35 {offsets = [0, 64], sizes = [16, 16], strides = [1, 1]} : vector<16x96xf32> to vector<16x16xf32>
    %39 = tpu.transpose %37, [1, 0] : vector<16x16xf32> -> vector<16x16xf32>
    %cst_22 = arith.constant dense<0.000000e+00> : vector<16x16xf32>
    %40 = tpu.matmul %36, %39, %cst_22 {dimension_numbers = #tpu.dot_dimension_numbers<[1], [0], [0], [1], [0, 0, 1, 1], [], []>} : vector<16x16xf32>, vector<16x16xf32>, vector<16x16xf32> -> vector<16x16xf32>
    %cst_23 = arith.constant 2.500000e-01 : f32
    %41 = vector.broadcast %cst_23 : f32 to vector<16x16xf32>
    %42 = arith.mulf %40, %41 : vector<16x16xf32>
    %cst_24 = arith.constant dense<0xFF800000> : vector<16xf32>
    %43 = vector.multi_reduction <maximumf>, %42, %cst_24 [1] : vector<16x16xf32> to vector<16xf32>
    %44 = vector.shape_cast %43 : vector<16xf32> to vector<16x1xf32>
    %45 = vector.broadcast %44 : vector<16x1xf32> to vector<16x16xf32>
    %46 = arith.subf %42, %45 : vector<16x16xf32>
    %47 = math.exp %46 : vector<16x16xf32>
    %cst_25 = arith.constant dense<0.000000e+00> : vector<16xf32>
    %48 = vector.multi_reduction <add>, %47, %cst_25 [1] : vector<16x16xf32> to vector<16xf32>
    %49 = vector.shape_cast %48 : vector<16xf32> to vector<16x1xf32>
    %50 = tpu.reciprocal %49 {approx = true} : vector<16x1xf32> -> vector<16x1xf32>
    %51 = vector.broadcast %50 : vector<16x1xf32> to vector<16x16xf32>
    %52 = arith.mulf %47, %51 : vector<16x16xf32>
    %cst_26 = arith.constant dense<0.000000e+00> : vector<16x16xf32>
    %53 = tpu.matmul %52, %38, %cst_26 {dimension_numbers = #tpu.dot_dimension_numbers<[1], [0], [0], [1], [0, 0, 1, 1], [], []>} : vector<16x16xf32>, vector<16x16xf32>, vector<16x16xf32> -> vector<16x16xf32>
    %54 = vector.extract_strided_slice %35 {offsets = [0, 16], sizes = [16, 16], strides = [1, 1]} : vector<16x96xf32> to vector<16x16xf32>
    %55 = vector.extract_strided_slice %35 {offsets = [0, 48], sizes = [16, 16], strides = [1, 1]} : vector<16x96xf32> to vector<16x16xf32>
    %56 = vector.extract_strided_slice %35 {offsets = [0, 80], sizes = [16, 16], strides = [1, 1]} : vector<16x96xf32> to vector<16x16xf32>
    %57 = tpu.transpose %55, [1, 0] : vector<16x16xf32> -> vector<16x16xf32>
    %cst_27 = arith.constant dense<0.000000e+00> : vector<16x16xf32>
    %58 = tpu.matmul %54, %57, %cst_27 {dimension_numbers = #tpu.dot_dimension_numbers<[1], [0], [0], [1], [0, 0, 1, 1], [], []>} : vector<16x16xf32>, vector<16x16xf32>, vector<16x16xf32> -> vector<16x16xf32>
    %cst_28 = arith.constant 2.500000e-01 : f32
    %59 = vector.broadcast %cst_28 : f32 to vector<16x16xf32>
    %60 = arith.mulf %58, %59 : vector<16x16xf32>
    %cst_29 = arith.constant dense<0xFF800000> : vector<16xf32>
    %61 = vector.multi_reduction <maximumf>, %60, %cst_29 [1] : vector<16x16xf32> to vector<16xf32>
    %62 = vector.shape_cast %61 : vector<16xf32> to vector<16x1xf32>
    %63 = vector.broadcast %62 : vector<16x1xf32> to vector<16x16xf32>
    %64 = arith.subf %60, %63 : vector<16x16xf32>
    %65 = math.exp %64 : vector<16x16xf32>
    %cst_30 = arith.constant dense<0.000000e+00> : vector<16xf32>
    %66 = vector.multi_reduction <add>, %65, %cst_30 [1] : vector<16x16xf32> to vector<16xf32>
    %67 = vector.shape_cast %66 : vector<16xf32> to vector<16x1xf32>
    %68 = tpu.reciprocal %67 {approx = true} : vector<16x1xf32> -> vector<16x1xf32>
    %69 = vector.broadcast %68 : vector<16x1xf32> to vector<16x16xf32>
    %70 = arith.mulf %65, %69 : vector<16x16xf32>
    %cst_31 = arith.constant dense<0.000000e+00> : vector<16x16xf32>
    %71 = tpu.matmul %70, %56, %cst_31 {dimension_numbers = #tpu.dot_dimension_numbers<[1], [0], [0], [1], [0, 0, 1, 1], [], []>} : vector<16x16xf32>, vector<16x16xf32>, vector<16x16xf32> -> vector<16x16xf32>
    %72 = tpu.concatenate %53, %71 in 1 : vector<16x16xf32>, vector<16x16xf32> -> vector<16x32xf32>
    %c0_32 = arith.constant 0 : index
    %c0_33 = arith.constant 0 : index
    %73 = vector.load %arg9[%c0_32, %c0_33] : memref<32x32xf32, #tpu.memory_space<vmem>>, vector<32x32xf32>
    %cst_34 = arith.constant dense<0.000000e+00> : vector<16x32xf32>
    %74 = tpu.matmul %72, %73, %cst_34 {dimension_numbers = #tpu.dot_dimension_numbers<[1], [0], [0], [1], [0, 0, 1, 1], [], []>} : vector<16x32xf32>, vector<32x32xf32>, vector<16x32xf32> -> vector<16x32xf32>
    %75 = arith.addf %8, %74 : vector<16x32xf32>
    %c0_35 = arith.constant 0 : index
    %c0_36 = arith.constant 0 : index
    %76 = vector.load %arg10[%c0_35, %c0_36] : memref<1x32xf32, #tpu.memory_space<vmem>>, vector<1x32xf32>
    %77 = vector.broadcast %76 : vector<1x32xf32> to vector<16x32xf32>
    %78 = arith.addf %75, %77 : vector<16x32xf32>
    %c0_37 = arith.constant 0 : index
    %c0_38 = arith.constant 0 : index
    %79 = vector.load %arg11[%c0_37, %c0_38] : memref<1x32xf32, #tpu.memory_space<vmem>>, vector<1x32xf32>
    %c0_39 = arith.constant 0 : index
    %c0_40 = arith.constant 0 : index
    %80 = vector.load %arg12[%c0_39, %c0_40] : memref<1x32xf32, #tpu.memory_space<vmem>>, vector<1x32xf32>
    %cst_41 = arith.constant dense<0.000000e+00> : vector<16xf32>
    %81 = vector.multi_reduction <add>, %78, %cst_41 [1] : vector<16x32xf32> to vector<16xf32>
    %82 = vector.shape_cast %81 : vector<16xf32> to vector<16x1xf32>
    %cst_42 = arith.constant 3.200000e+01 : f32
    %83 = vector.broadcast %cst_42 : f32 to vector<16x1xf32>
    %84 = arith.divf %82, %83 : vector<16x1xf32>
    %85 = vector.broadcast %84 : vector<16x1xf32> to vector<16x32xf32>
    %86 = arith.subf %78, %85 : vector<16x32xf32>
    %87 = arith.mulf %86, %86 : vector<16x32xf32>
    %cst_43 = arith.constant dense<0.000000e+00> : vector<16xf32>
    %88 = vector.multi_reduction <add>, %87, %cst_43 [1] : vector<16x32xf32> to vector<16xf32>
    %89 = vector.shape_cast %88 : vector<16xf32> to vector<16x1xf32>
    %cst_44 = arith.constant 3.200000e+01 : f32
    %90 = vector.broadcast %cst_44 : f32 to vector<16x1xf32>
    %91 = arith.divf %89, %90 : vector<16x1xf32>
    %cst_45 = arith.constant 9.99999997E-7 : f32
    %92 = vector.broadcast %cst_45 : f32 to vector<16x1xf32>
    %93 = arith.addf %91, %92 : vector<16x1xf32>
    %94 = math.rsqrt %93 : vector<16x1xf32>
    %95 = vector.broadcast %94 : vector<16x1xf32> to vector<16x32xf32>
    %96 = arith.mulf %86, %95 : vector<16x32xf32>
    %97 = vector.broadcast %79 : vector<1x32xf32> to vector<16x32xf32>
    %98 = arith.mulf %96, %97 : vector<16x32xf32>
    %99 = vector.broadcast %80 : vector<1x32xf32> to vector<16x32xf32>
    %100 = arith.addf %98, %99 : vector<16x32xf32>
    %c0_46 = arith.constant 0 : index
    %c0_47 = arith.constant 0 : index
    %101 = vector.load %arg13[%c0_46, %c0_47] : memref<32x64xf32, #tpu.memory_space<vmem>>, vector<32x64xf32>
    %cst_48 = arith.constant dense<0.000000e+00> : vector<16x64xf32>
    %102 = tpu.matmul %100, %101, %cst_48 {dimension_numbers = #tpu.dot_dimension_numbers<[1], [0], [0], [1], [0, 0, 1, 1], [], []>} : vector<16x32xf32>, vector<32x64xf32>, vector<16x64xf32> -> vector<16x64xf32>
    %c0_49 = arith.constant 0 : index
    %c0_50 = arith.constant 0 : index
    %103 = vector.load %arg14[%c0_49, %c0_50] : memref<1x64xf32, #tpu.memory_space<vmem>>, vector<1x64xf32>
    %104 = vector.broadcast %103 : vector<1x64xf32> to vector<16x64xf32>
    %105 = arith.addf %102, %104 : vector<16x64xf32>
    %106 = arith.mulf %105, %105 : vector<16x64xf32>
    %107 = arith.mulf %105, %106 : vector<16x64xf32>
    %cst_51 = arith.constant 4.471500e-02 : f32
    %108 = vector.broadcast %cst_51 : f32 to vector<16x64xf32>
    %109 = arith.mulf %108, %107 : vector<16x64xf32>
    %110 = arith.addf %105, %109 : vector<16x64xf32>
    %cst_52 = arith.constant 0.797884583 : f32
    %111 = vector.broadcast %cst_52 : f32 to vector<16x64xf32>
    %112 = arith.mulf %111, %110 : vector<16x64xf32>
    %113 = math.tanh %112 : vector<16x64xf32>
    %cst_53 = arith.constant 1.000000e+00 : f32
    %114 = vector.broadcast %cst_53 : f32 to vector<16x64xf32>
    %115 = arith.addf %114, %113 : vector<16x64xf32>
    %cst_54 = arith.constant 5.000000e-01 : f32
    %116 = vector.broadcast %cst_54 : f32 to vector<16x64xf32>
    %117 = arith.mulf %116, %115 : vector<16x64xf32>
    %118 = arith.mulf %105, %117 : vector<16x64xf32>
    %c0_55 = arith.constant 0 : index
    %c0_56 = arith.constant 0 : index
    %119 = vector.load %arg15[%c0_55, %c0_56] : memref<64x32xf32, #tpu.memory_space<vmem>>, vector<64x32xf32>
    %cst_57 = arith.constant dense<0.000000e+00> : vector<16x32xf32>
    %120 = tpu.matmul %118, %119, %cst_57 {dimension_numbers = #tpu.dot_dimension_numbers<[1], [0], [0], [1], [0, 0, 1, 1], [], []>} : vector<16x64xf32>, vector<64x32xf32>, vector<16x32xf32> -> vector<16x32xf32>
    %121 = arith.addf %78, %120 : vector<16x32xf32>
    %c0_58 = arith.constant 0 : index
    %c0_59 = arith.constant 0 : index
    %122 = vector.load %arg16[%c0_58, %c0_59] : memref<1x32xf32, #tpu.memory_space<vmem>>, vector<1x32xf32>
    %123 = vector.broadcast %122 : vector<1x32xf32> to vector<16x32xf32>
    %124 = arith.addf %121, %123 : vector<16x32xf32>
    %c0_60 = arith.constant 0 : index
    %c0_61 = arith.constant 0 : index
    %125 = vector.load %arg17[%c0_60, %c0_61] : memref<1x32xf32, #tpu.memory_space<vmem>>, vector<1x32xf32>
    %c0_62 = arith.constant 0 : index
    %c0_63 = arith.constant 0 : index
    %126 = vector.load %arg18[%c0_62, %c0_63] : memref<1x32xf32, #tpu.memory_space<vmem>>, vector<1x32xf32>
    %cst_64 = arith.constant dense<0.000000e+00> : vector<16xf32>
    %127 = vector.multi_reduction <add>, %124, %cst_64 [1] : vector<16x32xf32> to vector<16xf32>
    %128 = vector.shape_cast %127 : vector<16xf32> to vector<16x1xf32>
    %cst_65 = arith.constant 3.200000e+01 : f32
    %129 = vector.broadcast %cst_65 : f32 to vector<16x1xf32>
    %130 = arith.divf %128, %129 : vector<16x1xf32>
    %131 = vector.broadcast %130 : vector<16x1xf32> to vector<16x32xf32>
    %132 = arith.subf %124, %131 : vector<16x32xf32>
    %133 = arith.mulf %132, %132 : vector<16x32xf32>
    %cst_66 = arith.constant dense<0.000000e+00> : vector<16xf32>
    %134 = vector.multi_reduction <add>, %133, %cst_66 [1] : vector<16x32xf32> to vector<16xf32>
    %135 = vector.shape_cast %134 : vector<16xf32> to vector<16x1xf32>
    %cst_67 = arith.constant 3.200000e+01 : f32
    %136 = vector.broadcast %cst_67 : f32 to vector<16x1xf32>
    %137 = arith.divf %135, %136 : vector<16x1xf32>
    %cst_68 = arith.constant 9.99999997E-7 : f32
    %138 = vector.broadcast %cst_68 : f32 to vector<16x1xf32>
    %139 = arith.addf %137, %138 : vector<16x1xf32>
    %140 = math.rsqrt %139 : vector<16x1xf32>
    %141 = vector.broadcast %140 : vector<16x1xf32> to vector<16x32xf32>
    %142 = arith.mulf %132, %141 : vector<16x32xf32>
    %143 = vector.broadcast %125 : vector<1x32xf32> to vector<16x32xf32>
    %144 = arith.mulf %142, %143 : vector<16x32xf32>
    %145 = vector.broadcast %126 : vector<1x32xf32> to vector<16x32xf32>
    %146 = arith.addf %144, %145 : vector<16x32xf32>
    %cst_69 = arith.constant dense<0.000000e+00> : vector<32xf32>
    %147 = vector.multi_reduction <add>, %146, %cst_69 [0] : vector<16x32xf32> to vector<32xf32>
    %148 = vector.shape_cast %147 : vector<32xf32> to vector<1x32xf32>
    %cst_70 = arith.constant 1.600000e+01 : f32
    %149 = vector.broadcast %cst_70 : f32 to vector<1x32xf32>
    %150 = arith.divf %148, %149 : vector<1x32xf32>
    %c0_71 = arith.constant 0 : index
    %c0_72 = arith.constant 0 : index
    %151 = vector.load %arg19[%c0_71, %c0_72] : memref<32x32xf32, #tpu.memory_space<vmem>>, vector<32x32xf32>
    %cst_73 = arith.constant dense<0.000000e+00> : vector<1x32xf32>
    %152 = tpu.matmul %150, %151, %cst_73 {dimension_numbers = #tpu.dot_dimension_numbers<[1], [0], [0], [1], [0, 0, 1, 1], [], []>} : vector<1x32xf32>, vector<32x32xf32>, vector<1x32xf32> -> vector<1x32xf32>
    %c0_74 = arith.constant 0 : index
    %c0_75 = arith.constant 0 : index
    %c0_76 = arith.constant 0 : index
    %153 = vector.load %arg20[%c0_74, %c0_75, %c0_76] : memref<1x1x32xf32, #tpu.memory_space<vmem>>, vector<1x1x32xf32>
    %154 = vector.shape_cast %153 : vector<1x1x32xf32> to vector<1x32xf32>
    %155 = vector.shape_cast %152 : vector<1x32xf32> to vector<1x1x32xf32>
    tpu.vector_store %arg20[%c0_74, %c0_75, %c0_76], %155 {strides = array<i32>} : memref<1x1x32xf32, #tpu.memory_space<vmem>>, vector<1x1x32xf32>,
    return
  }
  func.func @transform_0(%arg0: i32) -> (i32, i32, i32) {
    %c0_i32 = arith.constant 0 : i32
    %c0_i32_0 = arith.constant 0 : i32
    %c0_i32_1 = arith.constant 0 : i32
    return %arg0, %c0_i32, %c0_i32_0 : i32, i32, i32
  }
  func.func @transform_1(%arg0: i32) -> (i32, i32) {
    %c0_i32 = arith.constant 0 : i32
    %c0_i32_0 = arith.constant 0 : i32
    %c0_i32_1 = arith.constant 0 : i32
    return %c0_i32, %c0_i32_0 : i32, i32
  }
  func.func @transform_2(%arg0: i32) -> (i32, i32) {
    %c0_i32 = arith.constant 0 : i32
    %c0_i32_0 = arith.constant 0 : i32
    %c0_i32_1 = arith.constant 0 : i32
    return %c0_i32, %c0_i32_0 : i32, i32
  }
  func.func @transform_3(%arg0: i32) -> (i32, i32) {
    %c0_i32 = arith.constant 0 : i32
    %c0_i32_0 = arith.constant 0 : i32
    %c0_i32_1 = arith.constant 0 : i32
    return %c0_i32, %c0_i32_0 : i32, i32
  }
  func.func @transform_4(%arg0: i32) -> (i32, i32) {
    %c0_i32 = arith.constant 0 : i32
    %c0_i32_0 = arith.constant 0 : i32
    %c0_i32_1 = arith.constant 0 : i32
    return %c0_i32, %c0_i32_0 : i32, i32
  }
  func.func @transform_5(%arg0: i32) -> (i32, i32) {
    %c0_i32 = arith.constant 0 : i32
    %c0_i32_0 = arith.constant 0 : i32
    %c0_i32_1 = arith.constant 0 : i32
    return %c0_i32, %c0_i32_0 : i32, i32
  }
  func.func @transform_6(%arg0: i32) -> (i32, i32) {
    %c0_i32 = arith.constant 0 : i32
    %c0_i32_0 = arith.constant 0 : i32
    %c0_i32_1 = arith.constant 0 : i32
    return %c0_i32, %c0_i32_0 : i32, i32
  }
  func.func @transform_7(%arg0: i32) -> (i32, i32) {
    %c0_i32 = arith.constant 0 : i32
    %c0_i32_0 = arith.constant 0 : i32
    %c0_i32_1 = arith.constant 0 : i32
    return %c0_i32, %c0_i32_0 : i32, i32
  }
  func.func @transform_8(%arg0: i32) -> (i32, i32) {
    %c0_i32 = arith.constant 0 : i32
    %c0_i32_0 = arith.constant 0 : i32
    %c0_i32_1 = arith.constant 0 : i32
    return %c0_i32, %c0_i32_0 : i32, i32
  }
  func.func @transform_9(%arg0: i32) -> (i32, i32) {
    %c0_i32 = arith.constant 0 : i32
    %c0_i32_0 = arith.constant 0 : i32
    %c0_i32_1 = arith.constant 0 : i32
    return %c0_i32, %c0_i32_0 : i32, i32
  }
  func.func @transform_10(%arg0: i32) -> (i32, i32) {
    %c0_i32 = arith.constant 0 : i32
    %c0_i32_0 = arith.constant 0 : i32
    %c0_i32_1 = arith.constant 0 : i32
    return %c0_i32, %c0_i32_0 : i32, i32
  }
  func.func @transform_11(%arg0: i32) -> (i32, i32) {
    %c0_i32 = arith.constant 0 : i32
    %c0_i32_0 = arith.constant 0 : i32
    %c0_i32_1 = arith.constant 0 : i32
    return %c0_i32, %c0_i32_0 : i32, i32
  }
  func.func @transform_12(%arg0: i32) -> (i32, i32) {
    %c0_i32 = arith.constant 0 : i32
    %c0_i32_0 = arith.constant 0 : i32
    %c0_i32_1 = arith.constant 0 : i32
    return %c0_i32, %c0_i32_0 : i32, i32
  }
  func.func @transform_13(%arg0: i32) -> (i32, i32) {
    %c0_i32 = arith.constant 0 : i32
    %c0_i32_0 = arith.constant 0 : i32
    %c0_i32_1 = arith.constant 0 : i32
    return %c0_i32, %c0_i32_0 : i32, i32
  }
  func.func @transform_14(%arg0: i32) -> (i32, i32) {
    %c0_i32 = arith.constant 0 : i32
    %c0_i32_0 = arith.constant 0 : i32
    %c0_i32_1 = arith.constant 0 : i32
    return %c0_i32, %c0_i32_0 : i32, i32
  }
  func.func @transform_15(%arg0: i32) -> (i32, i32) {
    %c0_i32 = arith.constant 0 : i32
    %c0_i32_0 = arith.constant 0 : i32
    %c0_i32_1 = arith.constant 0 : i32
    return %c0_i32, %c0_i32_0 : i32, i32
  }
  func.func @transform_16(%arg0: i32) -> (i32, i32) {
    %c0_i32 = arith.constant 0 : i32
    %c0_i32_0 = arith.constant 0 : i32
    %c0_i32_1 = arith.constant 0 : i32
    return %c0_i32, %c0_i32_0 : i32, i32
  }
  func.func @transform_17(%arg0: i32) -> (i32, i32) {
    %c0_i32 = arith.constant 0 : i32
    %c0_i32_0 = arith.constant 0 : i32
    %c0_i32_1 = arith.constant 0 : i32
    return %c0_i32, %c0_i32_0 : i32, i32
  }
  func.func @transform_18(%arg0: i32) -> (i32, i32) {
    %c0_i32 = arith.constant 0 : i32
    %c0_i32_0 = arith.constant 0 : i32
    %c0_i32_1 = arith.constant 0 : i32
    return %c0_i32, %c0_i32_0 : i32, i32
  }
  func.func @transform_19(%arg0: i32) -> (i32, i32, i32) {
    %c0_i32 = arith.constant 0 : i32
    %c0_i32_0 = arith.constant 0 : i32
    %c0_i32_1 = arith.constant 0 : i32
    return %arg0, %c0_i32, %c0_i32_0 : i32, i32, i32
  }
}

</mosaic_0001>

<bundles_post_ra>
// kernel: get_image_features.1
= control target key start
LH: loop header
LB: loop body
LE: loop exit
PB: predicated region body
PF: predicated region fallthrough
CT: control target
= control target key end

     0   :  { %s1928_s0 = inlined_call_operand.vmem [shape: f32[2,16,48], index: 0, kind: input, shape index: {}]   ;;  %s1929_s1 = inlined_call_operand.vmem [shape: f32[48,32], index: 1, kind: input, shape index: {}]   ;;  %s1930_s2 = inlined_call_operand.vmem [shape: f32[1,32], index: 2, kind: input, shape index: {}]   ;;  %s1931_s3 = inlined_call_operand.vmem [shape: f32[16,32], index: 3, kind: input, shape index: {}]   ;;  %s1932_s4 = inlined_call_operand.vmem [shape: f32[1,32], index: 4, kind: input, shape index: {}]   ;;  %s1933_s5 = inlined_call_operand.vmem [shape: f32[1,32], index: 5, kind: input, shape index: {}]   ;;  %s1934_s6 = inlined_call_operand.vmem [shape: f32[32,96], index: 6, kind: input, shape index: {}]   ;;  %s1935_s7 = inlined_call_operand.vmem [shape: f32[1,96], index: 7, kind: input, shape index: {}]   ;;  %s1936_s8 = inlined_call_operand.vmem [shape: f32[32,32], index: 8, kind: input, shape index: {}]   ;;  %s1937_s9 = inlined_call_operand.vmem [shape: f32[1,32], index: 9, kind: input, shape index: {}]   ;;  %s1938_s10 = inlined_call_operand.vmem [shape: f32[1,32], index: 10, kind: input, shape index: {}]   ;;  %s1939_s11 = inlined_call_operand.vmem [shape: f32[1,32], index: 11, kind: input, shape index: {}]   ;;  %s1940_s12 = inlined_call_operand.vmem [shape: f32[32,64], index: 12, kind: input, shape index: {}]   ;;  %s1941_s13 = inlined_call_operand.vmem [shape: f32[1,64], index: 13, kind: input, shape index: {}]   ;;  %s1942_s14 = inlined_call_operand.vmem [shape: f32[64,32], index: 14, kind: input, shape index: {}]   ;;  %s1943_s15 = inlined_call_operand.vmem [shape: f32[1,32], index: 15, kind: input, shape index: {}]   ;;  %s1944_s16 = inlined_call_operand.vmem [shape: f32[1,32], index: 16, kind: input, shape index: {}]   ;;  %s1945_s17 = inlined_call_operand.vmem [shape: f32[1,32], index: 17, kind: input, shape index: {}]   ;;  %s1946_s18 = inlined_call_operand.vmem [shape: f32[32,32], index: 18, kind: input, shape index: {}]   ;;  %s1947_s19 = inlined_call_operand.hbm [shape: f32[2,1,32], index: 19, kind: output, shape index: {}]  }
   0x1   :  { %1959 = sst [smem:[#allocation12_spill]] %s1928_s0 }
   0x2   :  { %1960 = sst [smem:[#allocation13_spill]] %s1929_s1 }
   0x3   :  { %1961 = sst [smem:[#allocation14_spill]] %s1930_s2 }
   0x4   :  { %1962 = sst [smem:[#allocation15_spill]] %s1931_s3 }
   0x5   :  { %1963 = sst [smem:[#allocation16_spill]] %s1932_s4 }
   0x6   :  { %1964 = sst [smem:[#allocation17_spill]] %s1933_s5 }
   0x7   :  { %1965 = sst [smem:[#allocation18_spill]] %s1934_s6 }
   0x8   :  { %1966 = sst [smem:[#allocation19_spill]] %s1947_s19 }
   0x9   :  { %24 = vsyncpa [#allocation3], 0 }
   0xa   :  { %26 = vsyncpa [#allocation3 + $0x1], 0  ;;  %s1630_s0 = smov 0   ;;  %s1632_s30 = smov 0  }
   0xb   :  { %s1634_s20 = smov 0   ;;  %s1636_s21 = smov 0  }
   0xc LB: > { %1967 = sst [smem:[#allocation5_spill]] %s1508_s0  ;;  %s1651_s1 = sadd.s32 4294967295, %s1520_s21   ;;  %s1520_s21 = sphi %s1636_s21, %s1990_s21   ;;  %s1516_s20 = sphi %s1634_s20, %s1992_s20   ;;  %s1512_s30 = sphi %s1632_s30, %s1994_s30   ;;  %s1508_s0 = sphi %s1630_s0, %s1993_s0  }
   0xd   : > { %1968 = sst [smem:[#allocation6_spill]] %s1516_s20  ;;  %s1320_s22 = sadd.s32 4294967294, %s1520_s21  }
   0xe   : > { %1969 = sst [smem:[#allocation7_spill]] %s1520_s21  ;;  %s1655_s2 = sadd.s32 1, %s1520_s21  }
   0xf   : > { %1970 = sst [smem:[#allocation8_spill]] %s1655_s2  ;;  %s443_s23 = sadd.s32 1, %s1516_s20 }
  0x10   : > { %s440_s24 = ssub.s32 %s1520_s21, %s1655_s2  ;;  %p453_p0 = scmp.ne.s32.totalorder %s1516_s20, %s1512_s30 }
  0x11   : > { %p441_p1 = scmp.eq.s32.totalorder %s440_s24, 0  ;;  %p454_p2 = scmp.eq.s32.totalorder %s1651_s1, 1 }
  0x12   : > { %p459_p3 = scmp.ne.s32.totalorder %s1512_s30, %s1508_s0  ;;  %p460_p4 = scmp.eq.s32.totalorder %s1320_s22, 1 }
  0x13   : > { %s1666_s25 = scalar_select %p441_p1, %s1516_s20, %s443_s23  }
  0x14   : > { %p1668_p5 = por %p454_p2, %p453_p0  ;;  %p1672_p6 = por %p460_p4, %p459_p3 }
  0x15   : > { %1971 = sst [smem:[#allocation9_spill]] %s1666_s25  ;;  %p1323_p7 = scmp.ge.s32.totalorder %s1520_s21, 1 }
  0x16   : > { %s1972_s3 = scalar_select %p1668_p5, 1, 0 }
  0x17   : > { %s1974_s26 = scalar_select %p1672_p6, 1, 0 }
  0x18   : > { %1973 = sst [smem:[#allocation10_spill]] %s1972_s3  ;;  %p540_p8 = scmp.lt.s32.totalorder %s1520_s21, 3 }
  0x19   : > { %1975 = sst [smem:[#allocation11_spill]] %s1974_s26 }
  0x1a   : > { %p541_p9 = pnand %p1323_p7, %p540_p8 }
  0x1b   : > { %s1976_s29 = sld [smem:[#allocation13_spill]] (!%p541_p9)  ;;  %p595_p10 = scmp.lt.s32.totalorder (!%p541_p9), %s1651_s1, 1 }
  0x1c   : > { %544 = sbr.rel (%p541_p9) target bundleno = 2838 (0xb16), region = 96  ;;  %s1977_s21 = sld [smem:[#allocation12_spill]] (!%p541_p9) }
  0x1d   : > { %s1978_s0 = sld [smem:[#allocation14_spill]] (!%p541_p9)  ;;  %s1523_s23 = smov (!%p541_p9), 96  }
  0x1e   : > { %s1981_s6 = sld [smem:[#allocation18_spill]] (!%p541_p9)  ;;  %s1524_s25 = smov (!%p541_p9), 64  }
  0x1f   : > { %s1982_s4 = sld [smem:[#allocation16_spill]] (!%p541_p9)  ;;  %s1526_s2 = smov (!%p541_p9), 80  }
  0x20   : > { %s1983_s5 = sld [smem:[#allocation17_spill]] (!%p541_p9)  ;;  %s1528_s22 = smov (!%p541_p9), 16  }
  0x21   : > { %v607_v0 = vld [vmem:[%s1976_s29 + $0x28] sm:$0xff]  ;;  %v606_v1 = vld [vmem:[%s1976_s29 + $0x20] sm:$0xff]  ;;  %v605_v2 = vld [vmem:[%s1976_s29 + $0x18] sm:$0xff]  ;;  %s596_s20 = scalar_select %p595_p10, %s1651_s1, 1  ;;  %vm612_vm0 = vcmask 392192   ;;  %vm648_vm1 = vcmask 261120  }
  0x22   : > { %629 = vmatpush.msra.mxu0 %v607_v0  ;;  %v604_v3 = vld [vmem:[%s1976_s29 + $0x10] sm:$0xff]  ;;  %v603_v4 = vld [vmem:[%s1976_s29 + $0x8] sm:$0xff]  ;;  %v602_v5 = vld [vmem:[%s1976_s29] sm:$0xff]  ;;  %v1522_v19 = vmov 32.0   ;;  %vm753_vm9 = vcmask 130048  }
  0x23   : > { %s1351_s27 = sshll.u32 %s596_s20, 4  ;;  %v1411_v8 = vld [vmem:[%s1978_s0] ss:$0 sm:$0xff]  ;;  %1422 = vrcp.f32 %v1522_v19  ;;  %s1525_s20 = smov 112  }
  0x24   : > { %630 = vmatpush.msra.mxu0 %v606_v1  ;;  %s599_s19 = scalar_lea.vmem %s1977_s21, %s1351_s27  ;;  %s1979_s21 = sld [smem:[#allocation15_spill]]  ;;  %v713_v36 = vld [vmem:[%s1981_s6 + $0x18] sm:$0xff]  ;;  %v712_v37 = vld [vmem:[%s1981_s6 + $0x10] sm:$0xff]  ;;  %v711_v38 = vld [vmem:[%s1981_s6 + $0x8] sm:$0xff] }
  0x25   : > { %v600_v6 = vld [vmem:[%s599_s19] sm:$0xff]  ;;  %v601_v7 = vld [vmem:[%s599_s19 + $0x8] sm:$0xff]  ;;  %736 = vmatpush.msra.mxu1 %v713_v36  ;;  %s1527_s0 = smov 48  }
  0x26   : > { %631 = vmatpush.msra.mxu0 %v605_v2  ;;  %v710_v39 = vld [vmem:[%s1981_s6] sm:$0xff] }
  0x27   : > { %737 = vmatpush.msra.mxu1 %v712_v37  ;;  %v1412_v54 = vld [vmem:[%s1982_s4] ss:$0 sm:$0xff] }
  0x28   : > { %632 = vmatpush.msra.mxu0 %v604_v3  ;;  %v1413_v58 = vld [vmem:[%s1983_s5] ss:$0 sm:$0xff] }
  0x29   : > { %v1423_v20 = vpop.eup %1422  ;;  %738 = vmatpush.msra.mxu1 %v711_v38 }
  0x2a   : > { %633 = vmatpush.msra.mxu0 %v603_v4  ;;  %s1980_s27 = smov %s1979_s21  ;;  %v642_v10 = vld [vmem:[%s1979_s21] sm:$0xff]  ;;  %v656_v21 = vmul.f32 32.0, %v1423_v20  ;;  %vm660_vm2 = vweird.f32 %v1423_v20 }
  0x2b   : > { %v643_v15 = vld [vmem:[%s1980_s27 + $0x8] sm:$0xff]  ;;  %739 = vmatpush.msra.mxu1 %v710_v39 }
  0x2c   : > { %634 = vmatpush.msra.mxu0 %v602_v5  ;;  %v657_v22 = vsub.f32 1.0, %v656_v21  ;;  %v1414_v5 = vld [vmem:[%s1935_s7] ss:$0 sm:$0xff] }
  0x2d   : > { %1326 = vmatmul.msk.f32.vlgmr.msra.gmra.mxu0 %vm612_vm0, %v600_v6 }
  0x2e   : > { %v658_v23 = vmul.f32 %v1423_v20, %v657_v22 }
  0x30   : > { %v659_v24 = vadd.f32 %v1423_v20, %v658_v23 }
  0x32   : > { %v1718_v25 = vsel %vm660_vm2, %v1423_v20, %v659_v24 }
  0x35   : > { %1327 = vmatmul.msk.f32.gmra.mxu0 %vm612_vm0, %v601_v7  ;;  %vm1112_vm0 = vcmask 523264  }
  0xaa   : > { %v636_v9 = vpop.f32.mrf.mxu0 }
  0xab   : > { %v637_v11 = vadd.f32 %v1411_v8, %v636_v9 }
  0xad   : > { %v1707_v12 = vadd.f32 %v642_v10, %v637_v11 }
  0xaf   : > { %v649_v13 = vsel %vm648_vm1, %v1707_v12, 0.0 }
  0xb0   : > { %650 = vadd.xlane.f32.xlu0 %v649_v13 }
  0xb2   : > { %v639_v14 = vpop.f32.mrf.mxu0 }
  0xb3   : > { %v640_v16 = vadd.f32 %v1411_v8, %v639_v14 }
  0xb5   : > { %v1714_v17 = vadd.f32 %v643_v15, %v640_v16 }
  0xb7   : > { %v652_v18 = vsel %vm648_vm1, %v1714_v17, 0.0 }
  0xb8   : > { %653 = vadd.xlane.f32.xlu0 %v652_v18 }
 0x123   : > { %v651_v26 = vpop.xlane.xlu0 %650 }
 0x124   : > { %v662_v27 = vmul.f32 %v1718_v25, %v651_v26 }
 0x126   : > { %v664_v28 = vsub.f32 %v1707_v12, %v662_v27 }
 0x128   : > { %v666_v29 = vmul.f32 %v664_v28, %v664_v28 }
 0x12a   : > { %v668_v30 = vsel %vm648_vm1, %v666_v29, 0.0 }
 0x12b   : > { %669 = vadd.xlane.f32.xlu1 %v668_v30  ;;  %v654_v31 = vpop.xlane.xlu0 %653 }
 0x12c   : > { %v663_v32 = vmul.f32 %v1718_v25, %v654_v31 }
 0x12e   : > { %v665_v33 = vsub.f32 %v1714_v17, %v663_v32 }
 0x130   : > { %v667_v34 = vmul.f32 %v665_v33, %v665_v33 }
 0x132   : > { %v671_v35 = vsel %vm648_vm1, %v667_v34, 0.0 }
 0x133   : > { %672 = vadd.xlane.f32.xlu1 %v671_v35 }
 0x19e   : > { %v670_v40 = vpop.xlane.xlu1 %669 }
 0x19f   : > { %v674_v41 = vmul.f32 %v670_v40, %v1718_v25 }
 0x1a1   : > { %v676_v42 = vadd.f32 1e-06, %v674_v41 }
 0x1a3   : > { %1424 = vrsqrt.f32 %v676_v42  ;;  %vm684_vm4 = vweird.f32 %v676_v42 }
 0x1a6   : > { %v673_v43 = vpop.xlane.xlu1 %672 }
 0x1a7   : > { %v675_v44 = vmul.f32 %v673_v43, %v1718_v25 }
 0x1a9   : > { %v1425_v45 = vpop.eup %1424  ;;  %v677_v46 = vadd.f32 1e-06, %v675_v44 }
 0x1aa   : > { %v679_v47 = vmul.f32 %v1425_v45, %v676_v42  ;;  %vm685_vm3 = vweird.f32 %v1425_v45 }
 0x1ab   : > { %1426 = vrsqrt.f32 %v677_v46  ;;  %vm686_vm5 = vmor %vm684_vm4, %vm685_vm3  ;;  %vm694_vm7 = vweird.f32 %v677_v46 }
 0x1ac   : > { %v680_v48 = vmul.f32 %v1425_v45, %v679_v47 }
 0x1ae   : > { %v681_v49 = vmul.f32 0.5, %v680_v48 }
 0x1b0   : > { %v682_v50 = vsub.f32 1.5, %v681_v49 }
 0x1b1   : > { %v1427_v51 = vpop.eup %1426 }
 0x1b2   : > { %v683_v52 = vmul.f32 %v1425_v45, %v682_v50  ;;  %v689_v53 = vmul.f32 %v1427_v51, %v677_v46  ;;  %vm695_vm6 = vweird.f32 %v1427_v51 }
 0x1b3   : > { %vm696_vm8 = vmor %vm694_vm7, %vm695_vm6 }
 0x1b4   : > { %v687_v55 = vsel %vm686_vm5, %v1425_v45, %v683_v52  ;;  %v690_v56 = vmul.f32 %v1427_v51, %v689_v53 }
 0x1b5   : > { %v698_v57 = vmul.f32 %v687_v55, %v664_v28 }
 0x1b6   : > { %v691_v59 = vmul.f32 0.5, %v690_v56 }
 0x1b7   : > { %v703_v60 = vmul.f32 %v1412_v54, %v698_v57 }
 0x1b8   : > { %v692_v61 = vsub.f32 1.5, %v691_v59 }
 0x1b9   : > { %v708_v62 = vadd.f32 %v1413_v58, %v703_v60 }
 0x1ba   : > { %v693_v63 = vmul.f32 %v1427_v51, %v692_v61 }
 0x1bb   : > { %1328 = vmatmul.msk.f32.vlgmr.msra.gmra.mxu1 %vm648_vm1, %v708_v62 }
 0x1bc   : > { %v697_v0 = vsel %vm696_vm8, %v1427_v51, %v693_v63 }
 0x1bd   : > { %v699_v1 = vmul.f32 %v697_v0, %v665_v33 }
 0x1bf   : > { %v704_v2 = vmul.f32 %v1412_v54, %v699_v1 }
 0x1c1   : > { %v709_v3 = vadd.f32 %v1413_v58, %v704_v2 }
 0x1c3   : > { %1329 = vmatmul.msk.f32.gmra.mxu1 %vm648_vm1, %v709_v3 }
 0x238   : > { %v741_v4 = vpop.f32.mrf.mxu1 }
 0x239   : > { %v742_v8 = vadd.f32 %v1414_v5, %v741_v4 }
 0x240   : > { %v744_v6 = vpop.f32.mrf.mxu1 }
 0x241   : > { %v745_v7 = vadd.f32 %v1414_v5, %v744_v6  ;;  %v955_v6 = vld [vmem:[%s1936_s8 + $0x18] sm:$0xff] }
 0x243   : > { %751 = vrot.lane.b32.xlu2 %v745_v7, %s1523_s23  ;;  %v1751_v9 = vpack.i.bf16 %v742_v8, %v745_v7 }
 0x24b   : > { %749 = vrot.lane.b32.xlu2 %v742_v8, %s1523_s23 }
 0x253   : > { %1402 = vrot.lane.b32.xlu2 %v1751_v9, %s1524_s25  ;;  %s593_s25 = sand.u32 1, %s1512_s30  }
 0x254   : > { %s594_s21 = scalar_lea.vmem [#allocation2], %s593_s25  ;;  %s1253_s28 = scalar_lea.sflag [#allocation3], %s593_s25 }
 0x255   : > { %s1263_s19 = sshll.u32 %s594_s21, 4  ;;  %s1264_s19 = int_to_ptr.vmem [resolvable:$true] %s1263_s19 }
 0x25b   : > { %844 = vrot.lane.b32.xlu2 %v742_v8, %s1525_s20 }
 0x263   : > { %846 = vrot.lane.b32.xlu2 %v745_v7, %s1525_s20 }
 0x29d   : > { %v752_v10 = vpop.permute.xlu2 %751 }
 0x29e   : > { %1330 = vmatpush.xpose.msk.msra.mxu2 %vm753_vm9, %v752_v10 }
 0x2a5   : > { %v750_v11 = vpop.permute.xlu2 %749 }
 0x2a6   : > { %1331 = vmatpush.xpose.msk.msra.mxu2 %vm753_vm9, %v750_v11  ;;  %v952_v11 = vld [vmem:[%s1936_s8] sm:$0xff] }
 0x2a9   : > { %1332 = vmatmul.msk.f32.vlgmr.msra.gmra.mxu2 %vm753_vm9, %v742_v8 }
 0x2ad   : > { %v1403_v13 = vpop.permute.xlu2 %1402 }
 0x2ae   : > { %v1404_v14 = vunpack.i.l.bf16 %v1403_v13  ;;  %v1405_v15 = vunpack.i.h.bf16 %v1403_v13 }
 0x2b0   : > { %835 = vmatpush.msrb.mxu2 %v1404_v14  ;;  %1352 = vmatpush.msra.mxu3 %v1404_v14 }
 0x2b1   : > { %1333 = vmatmul.msk.f32.gmra.mxu2 %vm753_vm9, %v745_v7 }
 0x2b2   : > { %836 = vmatpush.msrb.mxu2 %v1405_v15  ;;  %1353 = vmatpush.msra.mxu3 %v1405_v15 }
 0x2b4   : > { %974 = vmatpush.msra.mxu2 %v955_v6  ;;  %v1110_v6 = vld [vmem:[%s1942_s14 + $0x30] sm:$0xff] }
 0x2b5   : > { %v845_v34 = vpop.permute.xlu2 %844 }
 0x2bd   : > { %v847_v35 = vpop.permute.xlu2 %846 }
 0x32c   : > { %v779_v16 = vpop.f32.mrf.mxu2 }
 0x32d   : > { %v785_v28 = vmul.f32 0.25, %v779_v16 }
 0x32f   : > { %v787_v29 = vsel %vm753_vm9, %v785_v28, -inf }
 0x334   : > { %v782_v18 = vpop.f32.mrf.mxu2 }
 0x335   : > { %v786_v19 = vmul.f32 0.25, %v782_v18 }
 0x337   : > { %v790_v20 = vsel %vm753_vm9, %v786_v19, -inf }
 0x338   : > { %791 = vmax.xlane.f32.xlu0 %v790_v20 }
 0x34c   : > { %850 = vrot.lane.b32.xlu0 %v745_v7, %s1526_s2  ;;  %v954_v7 = vld [vmem:[%s1936_s8 + $0x10] sm:$0xff] }
 0x34d   : > { %975 = vmatpush.msra.mxu2 %v954_v7  ;;  %v1109_v7 = vld [vmem:[%s1942_s14 + $0x28] sm:$0xff] }
 0x3ab   : > { %v792_v21 = vpop.xlane.xlu0 %791 }
 0x3ac   : > { %v794_v22 = vsub.f32 %v786_v19, %v792_v21  ;;  %v1415_v19 = vld [vmem:[%s1937_s9] ss:$0 sm:$0xff] }
 0x3ae   : > { %v797_v23 = vmul.f32 1.442695, %v794_v22 }
 0x3b0   : > { %1428 = vpow2.f32 %v797_v23 }
 0x3b6   : > { %v1429_v24 = vpop.eup %1428 }
 0x3b7   : > { %v802_v26 = vsel %vm753_vm9, %v1429_v24, 0.0 }
 0x3b8   : > { %803 = vadd.xlane.f32.xlu1 %v802_v26 }
 0x3be   : > { %v851_v27 = vpop.permute.xlu0 %850 }
 0x3bf   : > { %1336 = vmatpush.xpose.msk.msrb.mxu3 %vm753_vm9, %v851_v27 }
 0x3d1   : > { %848 = vrot.lane.b32.xlu1 %v742_v8, %s1526_s2  ;;  %v953_v8 = vld [vmem:[%s1936_s8 + $0x8] sm:$0xff] }
 0x3d2   : > { %976 = vmatpush.msra.mxu2 %v953_v8  ;;  %v1108_v8 = vld [vmem:[%s1942_s14 + $0x20] sm:$0xff] }
 0x3d4   : > { %977 = vmatpush.msra.mxu2 %v952_v11  ;;  %v1105_v11 = vld [vmem:[%s1942_s14 + $0x8] sm:$0xff] }
 0x3fb   : > { %788 = vmax.xlane.f32.xlu1 %v787_v29 }
 0x42b   : > { %v804_v30 = vpop.xlane.xlu1 %803 }
 0x42c   : > { %1430 = vrcp.f32 %v804_v30 }
 0x432   : > { %v1431_v31 = vpop.eup %1430 }
 0x433   : > { %v808_v32 = vmul.f32 %v1431_v31, %v1429_v24 }
 0x435   : > { %1335 = vmatmul.msk.f32.vlgmr.msra.gmra.mxu3 %vm753_vm9, %v808_v32 }
 0x443   : > { %v849_v33 = vpop.permute.xlu1 %848 }
 0x444   : > { %1337 = vmatpush.xpose.msk.msrb.mxu3 %vm753_vm9, %v849_v33 }
 0x447   : > { %1338 = vmatmul.msk.f32.vlgmr.msrb.gmra.mxu3 %vm753_vm9, %v845_v34 }
 0x44f   : > { %1339 = vmatmul.msk.f32.gmra.mxu3 %vm753_vm9, %v847_v35 }
 0x46e   : > { %v789_v36 = vpop.xlane.xlu1 %788 }
 0x46f   : > { %v793_v37 = vsub.f32 %v785_v28, %v789_v36 }
 0x471   : > { %v795_v38 = vmul.f32 1.442695, %v793_v37  ;;  %v1052_v37 = vld [vmem:[%s1940_s12 + $0x18] sm:$0xff] }
 0x472   : > { %1075 = vmatpush.msrb.mxu0 %v1052_v37 }
 0x473   : > { %1432 = vpow2.f32 %v795_v38  ;;  %v1051_v38 = vld [vmem:[%s1940_s12 + $0x10] sm:$0xff] }
 0x474   : > { %1076 = vmatpush.msrb.mxu0 %v1051_v38 }
 0x479   : > { %v1433_v39 = vpop.eup %1432 }
 0x47a   : > { %v799_v40 = vsel %vm753_vm9, %v1433_v39, 0.0 }
 0x47b   : > { %800 = vadd.xlane.f32.xlu1 %v799_v40  ;;  %v1049_v40 = vld [vmem:[%s1940_s12] sm:$0xff] }
 0x4b8   : > { %v1767_v41 = vpop.f32.mrf.mxu3 }
 0x4ca   : > { %v877_v42 = vpop.f32.mrf.mxu3 }
 0x4cb   : > { %v883_v43 = vmul.f32 0.25, %v877_v42 }
 0x4cd   : > { %v885_v44 = vsel %vm753_vm9, %v883_v43, -inf }
 0x4ce   : > { %886 = vmax.xlane.f32.xlu2 %v885_v44 }
 0x4d2   : > { %v880_v45 = vpop.f32.mrf.mxu3 }
 0x4d3   : > { %v884_v46 = vmul.f32 0.25, %v880_v45 }
 0x4d5   : > { %v888_v47 = vsel %vm753_vm9, %v884_v46, -inf }
 0x4d6   : > { %889 = vmax.xlane.f32.xlu0 %v888_v47 }
 0x4ea   : > { %1407 = vrot.lane.b32.xlu0 %v1751_v9, %s1527_s0  ;;  %s1985_s0 = sld [smem:[#allocation19_spill]] }
 0x4ee   : > { %v801_v48 = vpop.xlane.xlu1 %800 }
 0x4ef   : > { %1434 = vrcp.f32 %v801_v48 }
 0x4f0   : > { %s1986_s26 = smov %s1985_s0  ;;  %s1261_s24 = scalar_lea.hbm %s1985_s0, %s1651_s1 }
 0x4f1   : > { %s1265_s3 = sshll.u32 %s1261_s24, 4  ;;  %s1478_s1 = scalar_lea.hbm %s1986_s26, 2  ;;  %s1266_s3 = int_to_ptr.hbm [resolvable:$true] %s1265_s3 }
 0x4f5   : > { %v1435_v49 = vpop.eup %1434 }
 0x4f6   : > { %v807_v50 = vmul.f32 %v1435_v49, %v1433_v39  ;;  %v1050_v39 = vld [vmem:[%s1940_s12 + $0x8] sm:$0xff] }
 0x4f7   : > { %1077 = vmatpush.msrb.mxu0 %v1050_v39  ;;  %v1419_v39 = vld [vmem:[%s1943_s15] ss:$0 sm:$0xff] }
 0x4f8   : > { %1334 = vmatmul.msk.f32.vlgmr.msrb.gmra.mxu2 %vm753_vm9, %v807_v50  ;;  %v1416_v50 = vld [vmem:[%s1938_s10] ss:$0 sm:$0xff] }
 0x4f9   : > { %1078 = vmatpush.msrb.mxu0 %v1049_v40 }
 0x541   : > { %v887_v51 = vpop.xlane.xlu2 %886 }
 0x542   : > { %v891_v52 = vsub.f32 %v883_v43, %v887_v51 }
 0x544   : > { %v893_v53 = vmul.f32 1.442695, %v891_v52 }
 0x546   : > { %1436 = vpow2.f32 %v893_v53  ;;  %v1417_v53 = vld [vmem:[%s1939_s11] ss:$0 sm:$0xff] }
 0x549   : > { %v890_v54 = vpop.xlane.xlu0 %889 }
 0x54a   : > { %v892_v55 = vsub.f32 %v884_v46, %v890_v54 }
 0x54c   : > { %v1437_v56 = vpop.eup %1436  ;;  %v895_v57 = vmul.f32 1.442695, %v892_v55 }
 0x54d   : > { %v897_v58 = vsel %vm753_vm9, %v1437_v56, 0.0 }
 0x54e   : > { %1438 = vpow2.f32 %v895_v57  ;;  %898 = vadd.xlane.f32.xlu2 %v897_v58 }
 0x554   : > { %v1439_v59 = vpop.eup %1438 }
 0x555   : > { %v900_v60 = vsel %vm753_vm9, %v1439_v59, 0.0 }
 0x556   : > { %901 = vadd.xlane.f32.xlu2 %v900_v60 }
 0x55c   : > { %v1408_v61 = vpop.permute.xlu0 %1407 }
 0x55d   : > { %v1409_v62 = vunpack.i.l.bf16 %v1408_v61  ;;  %v1410_v63 = vunpack.i.h.bf16 %v1408_v61 }
 0x55f   : > { %933 = vmatpush.msrb.mxu1 %v1409_v62 }
 0x561   : > { %934 = vmatpush.msrb.mxu1 %v1410_v63 }
 0x57b   : > { %v838_v13 = vpop.f32.mrf.mxu2 }
 0x5c1   : > { %v899_v0 = vpop.xlane.xlu2 %898 }
 0x5c2   : > { %1440 = vrcp.f32 %v899_v0 }
 0x5c8   : > { %v1441_v1 = vpop.eup %1440 }
 0x5c9   : > { %v902_v2 = vpop.xlane.xlu2 %901  ;;  %v905_v3 = vmul.f32 %v1441_v1, %v1437_v56 }
 0x5ca   : > { %1442 = vrcp.f32 %v902_v2 }
 0x5cb   : > { %1340 = vmatmul.msk.f32.vlgmr.msrb.gmra.mxu1 %vm753_vm9, %v905_v3 }
 0x5d0   : > { %v1443_v4 = vpop.eup %1442 }
 0x5d1   : > { %v906_v5 = vmul.f32 %v1443_v4, %v1439_v59 }
 0x5d3   : > { %1341 = vmatmul.msk.f32.gmra.mxu1 %vm753_vm9, %v906_v5  ;;  %v1111_v5 = vld [vmem:[%s1942_s14 + $0x38] sm:$0xff] }
 0x5d4   : > { %1127 = vmatpush.msra.mxu3 %v1111_v5  ;;  %v1223_v5 = vld [vmem:[%s1946_s18] sm:$0xff] }
 0x5d6   : > { %1128 = vmatpush.msra.mxu3 %v1110_v6 }
 0x5d8   : > { %1129 = vmatpush.msra.mxu3 %v1109_v7 }
 0x5da   : > { %1130 = vmatpush.msra.mxu3 %v1108_v8 }
 0x648   : > { %v936_v9 = vpop.f32.mrf.mxu1 }
 0x649   : > { %944 = vrot.lane.b32.xlu2 %v936_v9, %s1528_s22  ;;  %v1107_v9 = vld [vmem:[%s1942_s14 + $0x18] sm:$0xff] }
 0x64a   : > { %1131 = vmatpush.msra.mxu3 %v1107_v9 }
 0x650   : > { %v939_v10 = vpop.f32.mrf.mxu1 }
 0x651   : > { %946 = vrot.lane.b32.xlu1 %v939_v10, %s1528_s22  ;;  %v1106_v10 = vld [vmem:[%s1942_s14 + $0x10] sm:$0xff]  ;;  %s1472_s22 = sshra.s32 %s1266_s3, 4  ;;  %s1473_s22 = int_to_ptr.hbm [resolvable:$true] %s1472_s22 }
 0x652   : > { %1132 = vmatpush.msra.mxu3 %v1106_v10  ;;  %s1474_s4 = scalar_lea.hbm %s1473_s22, 1  ;;  %p1479_p0 = scmp.lt.s32.totalorder %s1473_s22, %s1986_s26 }
 0x653   : > { %p1475_p11 = scmp.ne.s32.totalorder %s1473_s22, %s1474_s4  ;;  %p1480_p1 = scmp.lt.s32.totalorder %s1478_s1, %s1474_s4 }
 0x654   : > { %1133 = vmatpush.msra.mxu3 %v1105_v11 }
 0x655   : > { %p1476_p12 = pnand %p1475_p11, %p1668_p5  ;;  %p1481_p2 = por %p1480_p1, %p1479_p0 }
 0x657   : > { %p1477_p13 = pneg %p1476_p12 }
 0x659   : > { %p1482_p3 = pnand %p1481_p2, %p1477_p13 }
 0x6a3   : > { %v945_v14 = vpop.permute.xlu2 %944 }
 0x6a4   : > { %v950_v15 = vsel %vm753_vm9, %v838_v13, %v945_v14  ;;  %v1104_v13 = vld [vmem:[%s1942_s14] sm:$0xff] }
 0x6a5   : > { %1342 = vmatmul.msk.f32.vlgmr.msra.gmra.mxu2 %vm648_vm1, %v950_v15  ;;  %1134 = vmatpush.msra.mxu3 %v1104_v13  ;;  %v1418_v14 = vld [vmem:[%s1941_s13] ss:$0 sm:$0xff]  ;;  %v1529_v13 = vmov 16.0  }
 0x6c3   : > { %v947_v16 = vpop.permute.xlu1 %946 }
 0x6c4   : > { %v951_v18 = vsel %vm753_vm9, %v1767_v41, %v947_v16  ;;  %vm1250_vm9 = vcmask 253952  }
 0x6c5   : > { %1343 = vmatmul.msk.f32.gmra.mxu2 %vm648_vm1, %v951_v18 }
 0x728   : > { %v979_v20 = vpop.f32.mrf.mxu2 }
 0x729   : > { %v985_v21 = vadd.f32 %v979_v20, %v1707_v12 }
 0x72b   : > { %v1798_v22 = vadd.f32 %v1415_v19, %v985_v21 }
 0x72d   : > { %v995_v23 = vsel %vm648_vm1, %v1798_v22, 0.0 }
 0x72e   : > { %996 = vadd.xlane.f32.xlu0 %v995_v23 }
 0x748   : > { %v982_v24 = vpop.f32.mrf.mxu2 }
 0x749   : > { %v986_v26 = vadd.f32 %v982_v24, %v1714_v17 }
 0x74b   : > { %v1803_v27 = vadd.f32 %v1415_v19, %v986_v26 }
 0x74d   : > { %v998_v28 = vsel %vm648_vm1, %v1803_v27, 0.0 }
 0x74e   : > { %999 = vadd.xlane.f32.xlu2 %v998_v28 }
 0x7a1   : > { %v997_v29 = vpop.xlane.xlu0 %996 }
 0x7a2   : > { %v1001_v30 = vmul.f32 %v997_v29, %v1718_v25 }
 0x7a4   : > { %v1003_v12 = vsub.f32 %v1798_v22, %v1001_v30 }
 0x7a6   : > { %v1005_v31 = vmul.f32 %v1003_v12, %v1003_v12 }
 0x7a8   : > { %v1007_v32 = vsel %vm648_vm1, %v1005_v31, 0.0 }
 0x7a9   : > { %1008 = vadd.xlane.f32.xlu1 %v1007_v32 }
 0x7c1   : > { %v1000_v33 = vpop.xlane.xlu2 %999 }
 0x7c2   : > { %v1002_v34 = vmul.f32 %v1000_v33, %v1718_v25 }
 0x7c4   : > { %v1004_v17 = vsub.f32 %v1803_v27, %v1002_v34 }
 0x7c6   : > { %v1006_v35 = vmul.f32 %v1004_v17, %v1004_v17 }
 0x7c8   : > { %v1010_v36 = vsel %vm648_vm1, %v1006_v35, 0.0 }
 0x7c9   : > { %1011 = vadd.xlane.f32.xlu0 %v1010_v36 }
 0x81c   : > { %v1009_v41 = vpop.xlane.xlu1 %1008 }
 0x81d   : > { %v1013_v42 = vmul.f32 %v1009_v41, %v1718_v25 }
 0x81f   : > { %v1015_v43 = vadd.f32 1e-06, %v1013_v42 }
 0x821   : > { %1444 = vrsqrt.f32 %v1015_v43  ;;  %vm1023_vm11 = vweird.f32 %v1015_v43 }
 0x827   : > { %v1445_v44 = vpop.eup %1444 }
 0x828   : > { %v1018_v45 = vmul.f32 %v1445_v44, %v1015_v43  ;;  %vm1024_vm10 = vweird.f32 %v1445_v44 }
 0x829   : > { %vm1025_vm12 = vmor %vm1023_vm11, %vm1024_vm10 }
 0x82a   : > { %v1019_v46 = vmul.f32 %v1445_v44, %v1018_v45 }
 0x82c   : > { %v1020_v47 = vmul.f32 0.5, %v1019_v46 }
 0x82e   : > { %v1021_v48 = vsub.f32 1.5, %v1020_v47 }
 0x830   : > { %v1022_v49 = vmul.f32 %v1445_v44, %v1021_v48 }
 0x832   : > { %v1026_v51 = vsel %vm1025_vm12, %v1445_v44, %v1022_v49 }
 0x833   : > { %v1037_v52 = vmul.f32 %v1026_v51, %v1003_v12 }
 0x835   : > { %v1042_v54 = vmul.f32 %v1416_v50, %v1037_v52 }
 0x837   : > { %v1047_v55 = vadd.f32 %v1417_v53, %v1042_v54 }
 0x839   : > { %1344 = vmatmul.msk.f32.vlgmr.msrb.gmra.mxu0 %vm648_vm1, %v1047_v55 }
 0x83c   : > { %v1012_v56 = vpop.xlane.xlu0 %1011 }
 0x83d   : > { %v1014_v57 = vmul.f32 %v1012_v56, %v1718_v25 }
 0x83f   : > { %v1016_v58 = vadd.f32 1e-06, %v1014_v57 }
 0x841   : > { %1446 = vrsqrt.f32 %v1016_v58  ;;  %vm1033_vm14 = vweird.f32 %v1016_v58 }
 0x847   : > { %v1447_v59 = vpop.eup %1446 }
 0x848   : > { %v1028_v60 = vmul.f32 %v1447_v59, %v1016_v58  ;;  %vm1034_vm13 = vweird.f32 %v1447_v59 }
 0x849   : > { %vm1035_vm15 = vmor %vm1033_vm14, %vm1034_vm13 }
 0x84a   : > { %v1029_v61 = vmul.f32 %v1447_v59, %v1028_v60 }
 0x84c   : > { %v1030_v62 = vmul.f32 0.5, %v1029_v61 }
 0x84e   : > { %v1031_v63 = vsub.f32 1.5, %v1030_v62 }
 0x850   : > { %v1032_v0 = vmul.f32 %v1447_v59, %v1031_v63  ;;  %v1226_v63 = vld [vmem:[%s1946_s18 + $0x18] sm:$0xff] }
 0x851   : > { %1242 = vmatpush.msra.mxu1 %v1226_v63 }
 0x852   : > { %v1036_v1 = vsel %vm1035_vm15, %v1447_v59, %v1032_v0  ;;  %v1225_v0 = vld [vmem:[%s1946_s18 + $0x10] sm:$0xff] }
 0x853   : > { %v1038_v2 = vmul.f32 %v1036_v1, %v1004_v17  ;;  %1243 = vmatpush.msra.mxu1 %v1225_v0 }
 0x855   : > { %v1043_v3 = vmul.f32 %v1416_v50, %v1038_v2 }
 0x857   : > { %v1048_v4 = vadd.f32 %v1417_v53, %v1043_v3  ;;  %v1224_v3 = vld [vmem:[%s1946_s18 + $0x8] sm:$0xff] }
 0x858   : > { %1244 = vmatpush.msra.mxu1 %v1224_v3 }
 0x859   : > { %1345 = vmatmul.msk.f32.gmra.mxu0 %vm648_vm1, %v1048_v4 }
 0x85a   : > { %1245 = vmatpush.msra.mxu1 %v1223_v5 }
 0x8b6   : > { %v1080_v15 = vpop.f32.mrf.mxu0 }
 0x8b7   : > { %v1081_v16 = vadd.f32 %v1418_v14, %v1080_v15 }
 0x8b9   : > { %v1086_v18 = vmul.f32 %v1081_v16, %v1081_v16 }
 0x8bb   : > { %v1088_v19 = vmul.f32 %v1086_v18, %v1081_v16 }
 0x8bd   : > { %v1090_v20 = vmul.f32 0.044715, %v1088_v19  ;;  %v1421_v19 = vld [vmem:[%s1945_s17] ss:$0 sm:$0xff] }
 0x8bf   : > { %v1092_v21 = vadd.f32 %v1090_v20, %v1081_v16 }
 0x8c1   : > { %v1094_v23 = vmul.f32 0.7978846, %v1092_v21 }
 0x8c3   : > { %1448 = vtanh.f32 %v1094_v23 }
 0x8c9   : > { %v1449_v24 = vpop.eup %1448 }
 0x8ca   : > { %v1098_v26 = vadd.f32 1.0, %v1449_v24 }
 0x8cc   : > { %v1100_v28 = vmul.f32 0.5, %v1098_v26 }
 0x8ce   : > { %v1102_v29 = vmul.f32 %v1100_v28, %v1081_v16 }
 0x8d0   : > { %1346 = vmatmul.msk.f32.vlgmr.msra.gmra.mxu3 %vm1112_vm0, %v1102_v29 }
 0x8d6   : > { %v1083_v30 = vpop.f32.mrf.mxu0 }
 0x8d7   : > { %v1084_v12 = vadd.f32 %v1418_v14, %v1083_v30  ;;  %v1420_v14 = vld [vmem:[%s1944_s16] ss:$0 sm:$0xff] }
 0x8d9   : > { %v1087_v31 = vmul.f32 %v1084_v12, %v1084_v12 }
 0x8db   : > { %v1089_v32 = vmul.f32 %v1087_v31, %v1084_v12 }
 0x8dd   : > { %v1091_v33 = vmul.f32 0.044715, %v1089_v32 }
 0x8df   : > { %v1093_v34 = vadd.f32 %v1091_v33, %v1084_v12 }
 0x8e1   : > { %v1095_v17 = vmul.f32 0.7978846, %v1093_v34 }
 0x8e3   : > { %1450 = vtanh.f32 %v1095_v17 }
 0x8e9   : > { %v1451_v35 = vpop.eup %1450 }
 0x8ea   : > { %v1099_v36 = vadd.f32 1.0, %v1451_v35 }
 0x8ec   : > { %v1101_v37 = vmul.f32 0.5, %v1099_v36 }
 0x8ee   : > { %v1103_v38 = vmul.f32 %v1101_v37, %v1084_v12 }
 0x8f0   : > { %1347 = vmatmul.msk.f32.gmra.mxu3 %vm1112_vm0, %v1103_v38 }
 0x953   : > { %v1136_v40 = vpop.f32.mrf.mxu3 }
 0x954   : > { %v1142_v41 = vadd.f32 %v1136_v40, %v1798_v22 }
 0x956   : > { %v1148_v42 = vadd.f32 %v1419_v39, %v1142_v41 }
 0x958   : > { %v1152_v43 = vsel %vm648_vm1, %v1148_v42, 0.0 }
 0x959   : > { %1153 = vadd.xlane.f32.xlu0 %v1152_v43 }
 0x973   : > { %v1139_v44 = vpop.f32.mrf.mxu3 }
 0x974   : > { %v1143_v45 = vadd.f32 %v1139_v44, %v1803_v27 }
 0x976   : > { %v1149_v46 = vadd.f32 %v1419_v39, %v1143_v45 }
 0x978   : > { %v1155_v47 = vsel %vm648_vm1, %v1149_v46, 0.0 }
 0x979   : > { %1156 = vadd.xlane.f32.xlu2 %v1155_v47 }
 0x9cc   : > { %v1154_v48 = vpop.xlane.xlu0 %1153 }
 0x9cd   : > { %v1158_v49 = vmul.f32 %v1154_v48, %v1718_v25 }
 0x9cf   : > { %v1160_v50 = vsub.f32 %v1148_v42, %v1158_v49 }
 0x9d1   : > { %v1162_v51 = vmul.f32 %v1160_v50, %v1160_v50 }
 0x9d3   : > { %v1164_v52 = vsel %vm648_vm1, %v1162_v51, 0.0 }
 0x9d4   : > { %1165 = vadd.xlane.f32.xlu0 %v1164_v52 }
 0x9ec   : > { %v1157_v22 = vpop.xlane.xlu2 %1156 }
 0x9ed   : > { %v1159_v53 = vmul.f32 %v1157_v22, %v1718_v25 }
 0x9ef   : > { %v1161_v54 = vsub.f32 %v1149_v46, %v1159_v53 }
 0x9f1   : > { %v1163_v55 = vmul.f32 %v1161_v54, %v1161_v54 }
 0x9f3   : > { %v1167_v56 = vsel %vm648_vm1, %v1163_v55, 0.0 }
 0x9f4   : > { %1168 = vadd.xlane.f32.xlu1 %v1167_v56 }
 0xa47   : > { %v1166_v27 = vpop.xlane.xlu0 %1165 }
 0xa48   : > { %v1170_v57 = vmul.f32 %v1166_v27, %v1718_v25 }
 0xa4a   : > { %v1172_v58 = vadd.f32 1e-06, %v1170_v57 }
 0xa4c   : > { %1452 = vrsqrt.f32 %v1172_v58  ;;  %vm1180_vm3 = vweird.f32 %v1172_v58 }
 0xa52   : > { %v1453_v59 = vpop.eup %1452 }
 0xa53   : > { %v1175_v60 = vmul.f32 %v1453_v59, %v1172_v58  ;;  %vm1181_vm2 = vweird.f32 %v1453_v59 }
 0xa54   : > { %vm1182_vm4 = vmor %vm1180_vm3, %vm1181_vm2 }
 0xa55   : > { %v1176_v61 = vmul.f32 %v1453_v59, %v1175_v60 }
 0xa57   : > { %v1177_v2 = vmul.f32 0.5, %v1176_v61 }
 0xa59   : > { %v1178_v6 = vsub.f32 1.5, %v1177_v2 }
 0xa5b   : > { %v1179_v7 = vmul.f32 %v1453_v59, %v1178_v6 }
 0xa5d   : > { %v1183_v9 = vsel %vm1182_vm4, %v1453_v59, %v1179_v7 }
 0xa5e   : > { %v1194_v15 = vmul.f32 %v1183_v9, %v1160_v50 }
 0xa60   : > { %v1199_v20 = vmul.f32 %v1420_v14, %v1194_v15 }
 0xa62   : > { %v1204_v26 = vadd.f32 %v1421_v19, %v1199_v20 }
 0xa64   : > { %v1206_v12 = vsel %vm648_vm1, %v1204_v26, 0.0 }
 0xa67   : > { %v1169_v62 = vpop.xlane.xlu1 %1168 }
 0xa68   : > { %v1171_v1 = vmul.f32 %v1169_v62, %v1718_v25 }
 0xa6a   : > { %v1173_v4 = vadd.f32 1e-06, %v1171_v1 }
 0xa6c   : > { %1454 = vrsqrt.f32 %v1173_v4  ;;  %vm1190_vm6 = vweird.f32 %v1173_v4 }
 0xa6d   : > { %1456 = vrcp.f32 %v1529_v13 }
 0xa72   : > { %v1455_v8 = vpop.eup %1454 }
 0xa73   : > { %v1185_v25 = vmul.f32 %v1455_v8, %v1173_v4  ;;  %vm1191_vm5 = vweird.f32 %v1455_v8  ;;  %v1457_v21 = vpop.eup %1456 }
 0xa74   : > { %vm1192_vm7 = vmor %vm1190_vm6, %vm1191_vm5  ;;  %v1216_v29 = vmul.f32 16.0, %v1457_v21  ;;  %vm1220_vm8 = vweird.f32 %v1457_v21 }
 0xa75   : > { %v1186_v10 = vmul.f32 %v1455_v8, %v1185_v25 }
 0xa76   : > { %v1217_v32 = vsub.f32 1.0, %v1216_v29 }
 0xa77   : > { %v1187_v11 = vmul.f32 0.5, %v1186_v10 }
 0xa78   : > { %v1218_v17 = vmul.f32 %v1457_v21, %v1217_v32 }
 0xa79   : > { %v1188_v16 = vsub.f32 1.5, %v1187_v11 }
 0xa7a   : > { %v1219_v37 = vadd.f32 %v1457_v21, %v1218_v17 }
 0xa7b   : > { %v1189_v18 = vmul.f32 %v1455_v8, %v1188_v16 }
 0xa7c   : > { %v1221_v40 = vsel %vm1220_vm8, %v1457_v21, %v1219_v37 }
 0xa7d   : > { %v1193_v23 = vsel %vm1192_vm7, %v1455_v8, %v1189_v18 }
 0xa7e   : > { %v1195_v24 = vmul.f32 %v1193_v23, %v1161_v54 }
 0xa80   : > { %v1200_v28 = vmul.f32 %v1420_v14, %v1195_v24 }
 0xa82   : > { %v1205_v30 = vadd.f32 %v1421_v19, %v1200_v28 }
 0xa84   : > { %v1207_v31 = vsel %vm648_vm1, %v1205_v30, 0.0 }
 0xa85   : > { %v1208_v33 = vadd.f32 %v1207_v31, %v1206_v12 }
 0xa87   : > { %v1209_v34 = vrot.slane %v1208_v33, 4 }
 0xa89   : > { %v1210_v35 = vadd.f32 %v1209_v34, %v1208_v33 }
 0xa8b   : > { %v1211_v36 = vrot.slane %v1210_v35, 2 }
 0xa8d   : > { %v1212_v38 = vadd.f32 %v1211_v36, %v1210_v35 }
 0xa8f   : > { %v1213_v39 = vrot.slane %v1212_v38, 1 }
 0xa91   : > { %v1214_v41 = vadd.f32 %v1213_v39, %v1212_v38 }
 0xa93   : > { %v1222_v42 = vmul.f32 %v1221_v40, %v1214_v41 }
 0xa95   : > { %1348 = vmatmul.msk.f32.vlgmr.msra.gmra.mxu1 %vm648_vm1, %v1222_v42 }
 0xb12   : > { %v1247_v43 = vpop.f32.mrf.mxu1 }
 0xb13   : > { %1251 = vst.msk [vmem:[%s594_s21] sm:$0x1] %vm1250_vm9, %v1247_v43 }
 0xb14   : > { %1485 = shalt.err (!%p1482_p3)
}
 0xb15   : > { %1354 = dma.vmem_to_hbm [thread:$0]  (%p1668_p5), %s1264_s19, 16, %s1266_s3, %s1253_s28  }
 0xb16 PF: > { %s1987_s25 = sld [smem:[#allocation7_spill]] }
 0xb17   : > { %s1988_s0 = sld [smem:[#allocation5_spill]] }
 0xb1c   : > { %p1360_p4 = scmp.ge.s32.totalorder %s1987_s25, 2 }
 0xb1d   : > { %s1277_s21 = sand.u32 1, %s1988_s0  }
 0xb1e   : > { %p1357_p7 = pnand %p1360_p4, %p1672_p6  ;;  %s1278_s5 = scalar_lea.sflag [#allocation3], %s1277_s21 }
 0xb20   : > { %p1358_p8 = pneg %p1357_p7 }
 0xb22   : > { %1503 = dma.done.wait (%p1358_p8), %s1278_s5, 16  }
 0xb23   : > { %1505 = vsyncadd (%p1358_p8), %s1278_s5, 4294967280  ;;  %s1990_s21 = sld [smem:[#allocation8_spill]]  ;;  %s1993_s0 = smov %s1512_s30 }
 0xb24   : > { %s1991_s4 = sld [smem:[#allocation6_spill]] }
 0xb25   : > { %s1992_s20 = sld [smem:[#allocation9_spill]] }
 0xb29   : > { %p29_p9 = scmp.ge.s32.totalorder %s1990_s21, 4  }
 0xb2a   : > { %s1994_s30 = smov %s1991_s4 }
 0xb2b   :  { %31 = sbr.rel (!%p29_p9) target bundleno = 12 (0xc), region = 131 }
 0xb30   :  { %1283 = vsyncpa [#allocation3], 1 }
 0xb31   :  { %1285 = vsyncpa [#allocation3 + $0x1], 1 }

</bundles_post_ra>
